<compile_context>
chip_gen: v6e
topology: v6e:2x2x1
jax: 0.10.0
libtpu: 0.0.40
codegen_flags: <defaults>
</compile_context>

<pallas_src>
import math

import jax
import jax.numpy as jnp
from jax.experimental import pallas as pl
from jax.experimental.pallas import tpu as pltpu


def _round_up(x, m):
    return ((x + m - 1) // m) * m


def _make_kernel(precision):
    def kernel(x_ref, w_ref, bias_ref, at_ref, bs_ref, o_ref):
        """Fused base addmm + LoRA delta for one (row-tile, col-tile) block."""
        x = x_ref[...]                                                       # (tm, C)
        # Base transform: x @ W (bias added in f32 below).
        base = jnp.dot(x, w_ref[...], precision=precision,
                       preferred_element_type=jnp.float32)                   # (tm, tn)
        # LoRA path: s = x @ a^T (rank padded to 128 lanes), lora = s @ (alpha*scale*b).
        s = jnp.dot(x, at_ref[...], precision=precision,
                    preferred_element_type=jnp.float32)                      # (tm, r_pad)
        lora = jnp.dot(s.astype(bs_ref.dtype), bs_ref[...], precision=precision,
                       preferred_element_type=jnp.float32)                   # (tm, tn)
        o_ref[...] = (base + bias_ref[...] + lora).astype(o_ref.dtype)
    return kernel


def dynamic_lora_c_attn(x, base_weight, base_bias, a_vectors, b_vectors, alpha,
                        *, row_tile=512, col_tile=1536, compute_dtype=None,
                        out_dtype=None, precision=None):
    """Forward pass of DynamicLoRACAttn.

    x:             (B, T, C)
    base_weight:   (in_dim, out_dim) or (out_dim, in_dim) (auto-detected like PyTorch;
                   ambiguous for square weights, matching the module's heuristic)
    base_bias:     (out_dim,)
    a_vectors:     (rank, in_dim)
    b_vectors:     (rank, out_dim)
    alpha:         (rank,)
    compute_dtype: e.g. jnp.bfloat16 (recommended on v5e/v6e/v7x; f32 accumulate).
    out_dtype:     output dtype (defaults to x.dtype); bf16 avoids HBM-write-bound
                   behaviour on v6e/v7x when compute_dtype is bf16.
    precision:     jax.lax.Precision for the dots (HIGHEST for strict f32 parity).
    """
    B, T, C = x.shape
    rank = a_vectors.shape[0]
    scale = 1.0 / math.sqrt(rank)

    # Mirror the module's transpose auto-detection (Conv1D stores (in_dim, out_dim)).
    if base_weight.shape[0] > base_weight.shape[1]:
        w = base_weight.T                            # (in_dim, out_dim)
    else:
        w = base_weight
    in_dim, out_dim = w.shape
    assert in_dim == C, (in_dim, C)

    # --- One-time wrapper preprocessing (outside the grid loop) ------------------
    a_t = a_vectors.T                                # (C, rank)   -- no in-kernel .T
    b_scaled = b_vectors * (alpha * scale)[:, None]  # (rank, out) -- alpha*scale folded in

    # Pad rank to a full 128-lane MXU pass (padded rows/cols are zeros -> exact math).
    r_pad = max(128, _round_up(rank, 128))
    if r_pad != rank:
        a_t = jnp.pad(a_t, ((0, 0), (0, r_pad - rank)))
        b_scaled = jnp.pad(b_scaled, ((0, r_pad - rank), (0, 0)))

    if out_dtype is None:
        out_dtype = x.dtype
    cdt = jnp.dtype(compute_dtype) if compute_dtype is not None else jnp.dtype(x.dtype)
    x = x.astype(cdt)
    w = w.astype(cdt)
    a_t = a_t.astype(cdt)
    b_scaled = b_scaled.astype(cdt)

    # --- Row tiling (16-aligned for packed dtypes, 8 for f32) --------------------
    cbytes = cdt.itemsize
    obytes = jnp.dtype(out_dtype).itemsize
    row_align = 8 if cbytes >= 4 else 16
    n = B * T
    x_2d = x.reshape(n, C)
    tm = min(row_tile, _round_up(n, row_align))
    n_pad = _round_up(n, tm)
    if n_pad != n:
        x_2d = jnp.pad(x_2d, ((0, n_pad - n), (0, 0)))

    # --- Column tiling of out_dim (bounds resident VMEM for big models) ----------
    if out_dim > col_tile:
        o128 = _round_up(out_dim, 128)
        nc = -(-o128 // col_tile)                    # number of column tiles
        tn = _round_up(-(-o128 // nc), 128)          # lane-dense, multiple of 128
    else:
        nc = 1
        tn = out_dim
    o_pad = nc * tn
    bias_1d = base_bias
    if o_pad != out_dim:
        w = jnp.pad(w, ((0, 0), (0, o_pad - out_dim)))
        b_scaled = jnp.pad(b_scaled, ((0, 0), (0, o_pad - out_dim)))
        bias_1d = jnp.pad(base_bias, (0, o_pad - out_dim))
    bias_2d = bias_1d.reshape(1, o_pad).astype(jnp.float32)

    # Column axis outermost: each W slab is DMA'd once and reused across all row tiles.
    grid = (nc, n_pad // tm)
    col_invariant = (nc == 1)

    # --- VMEM budget (residents single-buffered; x / out double-buffered) --------
    resident_bufs = 1 if col_invariant else 2
    vmem_est = (2 * tm * C * cbytes                                   # x stream
                + 2 * tm * tn * obytes                                # out stream
                + resident_bufs * (C * tn * cbytes                    # W slab
                                   + tn * 4                           # bias
                                   + r_pad * tn * cbytes)             # alpha*scale*b
                + C * r_pad * cbytes)                                 # a^T (always resident)
    vmem_limit = int(max(32 << 20, min(int(vmem_est * 1.5) + (4 << 20), 96 << 20)))

    # Advisory cost estimate so XLA schedules surrounding ops sensibly.
    flops = (2 * n_pad * C * o_pad            # base matmul
             + 2 * n_pad * C * r_pad          # x @ a^T
             + 2 * n_pad * r_pad * o_pad)     # s @ b_scaled
    bytes_accessed = (x_2d.size * cbytes + w.size * cbytes + a_t.size * cbytes
                      + b_scaled.size * cbytes + bias_2d.size * 4
                      + n_pad * o_pad * obytes)

    kernel = _make_kernel(precision)

    def build_and_call(single_buffer):
        def resident_spec(shape, index_map, invariant):
            if single_buffer and invariant:
                # Grid-invariant block: one buffer is enough (no second copy in VMEM).
                return pl.BlockSpec(shape, index_map, pipeline_mode=pl.Buffered(1))
            return pl.BlockSpec(shape, index_map)

        in_specs = [
            pl.BlockSpec((tm, C), lambda j, i: (i, 0)),                        # x row tile
            resident_spec((C, tn), lambda j, i: (0, j), col_invariant),        # W (slab)
            resident_spec((1, tn), lambda j, i: (0, j), col_invariant),        # bias
            resident_spec((C, r_pad), lambda j, i: (0, 0), True),              # a^T
            resident_spec((r_pad, tn), lambda j, i: (0, j), col_invariant),    # alpha*scale*b
        ]
        out_specs = pl.BlockSpec((tm, tn), lambda j, i: (i, j))

        return pl.pallas_call(
            kernel,
            out_shape=jax.ShapeDtypeStruct((n_pad, o_pad), out_dtype),
            grid_spec=pltpu.PrefetchScalarGridSpec(
                num_scalar_prefetch=0,
                grid=grid,
                in_specs=in_specs,
                out_specs=out_specs,
            ),
            compiler_params=pltpu.CompilerParams(
                dimension_semantics=("parallel", "parallel"),
                vmem_limit_bytes=vmem_limit,
            ),
            cost_estimate=pl.CostEstimate(
                flops=flops, transcendentals=0, bytes_accessed=bytes_accessed),
        )(x_2d, w, bias_2d, a_t, b_scaled)

    try:
        out_2d = build_and_call(True)
    except Exception:
        # Defensive fallback for Pallas versions that reject pipeline_mode=Buffered(1):
        # identical kernel, default double-buffering on all operands.
        out_2d = build_and_call(False)

    return out_2d[:n, :out_dim].reshape(B, T, out_dim)


def reference_forward(x, base_weight, base_bias, a_vectors, b_vectors, alpha):
    """Pure-JAX reference mirroring the PyTorch forward exactly."""
    B, T, C = x.shape
    rank = a_vectors.shape[0]
    scale = 1.0 / math.sqrt(rank)
    x_2d = x.reshape(B * T, C)
    if base_weight.shape[0] > base_weight.shape[1]:
        base_2d = base_bias + x_2d @ base_weight.T
    else:
        base_2d = base_bias + x_2d @ base_weight
    s = x_2d @ a_vectors.T                              # (N, rank)
    s_3d = s[:, :, None]                                # (N, rank, 1)
    b_3d = b_vectors[None, :, :]                        # (1, rank, out)
    alpha_3d = alpha[None, :, None]                     # (1, rank, 1)
    lora_2d = (s_3d * b_3d * alpha_3d * scale).sum(axis=1)
    out_2d = base_2d + lora_2d
    return out_2d.reshape(B, T, base_2d.shape[-1])


if __name__ == "__main__":
    # Small GPT-2-like config: hidden C=32, out_dim = 3*C (qkv), seq T=8, batch B=2.
    B, T, C = 2, 8, 32
    out_dim = 3 * C
    rank = 8

    key = jax.random.PRNGKey(0)
    k_x, k_w, k_b, k_a, k_bv = jax.random.split(key, 5)

    x = jax.random.normal(k_x, (B, T, C), dtype=jnp.float32)
    # GPT-2 Conv1D weight layout: (in_dim, out_dim) -> transpose_needed = False.
    base_weight = jax.random.normal(k_w, (C, out_dim), dtype=jnp.float32) * 0.02
    base_bias = jax.random.normal(k_b, (out_dim,), dtype=jnp.float32) * 0.02
    a_vectors = jax.random.normal(k_a, (rank, C), dtype=jnp.float32) * 0.01
    b_vectors = jax.random.normal(k_bv, (rank, out_dim), dtype=jnp.float32) * 0.01
    alpha = jnp.ones((rank,), dtype=jnp.float32) * 0.1

    # f32 demo so the 1e-5 check vs. the f32 reference is exact.
    # Production: compute_dtype=jnp.bfloat16 (also a win on v5e) and out_dtype=jnp.bfloat16.
    out = dynamic_lora_c_attn(x, base_weight, base_bias, a_vectors, b_vectors, alpha)
    out = jax.block_until_ready(out)

    ref = reference_forward(x, base_weight, base_bias, a_vectors, b_vectors, alpha)
    assert out.shape == (B, T, out_dim), out.shape
    assert jnp.allclose(out, ref, atol=1e-5, rtol=1e-5), \
        float(jnp.max(jnp.abs(out - ref)))

    print("KERNEL_OK")
</pallas_src>

<mosaic_0001>
module attributes {stable_mosaic.version = 11 : i64} {
  func.func @kernel(%arg0: i32, %arg1: i32, %arg2: memref<16x32xf32, #tpu.memory_space<vmem>>, %arg3: memref<32x96xf32, #tpu.memory_space<vmem>>, %arg4: memref<1x96xf32, #tpu.memory_space<vmem>>, %arg5: memref<32x128xf32, #tpu.memory_space<vmem>>, %arg6: memref<128x96xf32, #tpu.memory_space<vmem>>, %arg7: memref<16x96xf32, #tpu.memory_space<vmem>>) attributes {dimension_semantics = [#tpu.dimension_semantics<parallel>, #tpu.dimension_semantics<parallel>], iteration_bounds = array<i64: 1, 1>, scalar_prefetch = 0 : i64, scratch_operands = 0 : i64, tpu.core_type = #tpu.core_type<tc>, window_params = [{transform_indices = @transform_0, window_bounds = array<i64: 16, 32>}, {pipeline_mode = #tpu.pipeline_mode<synchronous>, transform_indices = @transform_1, window_bounds = array<i64: 32, 96>}, {pipeline_mode = #tpu.pipeline_mode<synchronous>, transform_indices = @transform_2, window_bounds = array<i64: 1, 96>}, {pipeline_mode = #tpu.pipeline_mode<synchronous>, transform_indices = @transform_3, window_bounds = array<i64: 32, 128>}, {pipeline_mode = #tpu.pipeline_mode<synchronous>, transform_indices = @transform_4, window_bounds = array<i64: 128, 96>}, {transform_indices = @transform_5, window_bounds = array<i64: 16, 96>}]} {
    %c0 = arith.constant 0 : index
    %c0_0 = arith.constant 0 : index
    %0 = vector.load %arg2[%c0, %c0_0] : memref<16x32xf32, #tpu.memory_space<vmem>>, vector<16x32xf32>
    %c0_1 = arith.constant 0 : index
    %c0_2 = arith.constant 0 : index
    %1 = vector.load %arg3[%c0_1, %c0_2] : memref<32x96xf32, #tpu.memory_space<vmem>>, vector<32x96xf32>
    %cst = arith.constant dense<0.000000e+00> : vector<16x96xf32>
    %2 = tpu.matmul %0, %1, %cst {dimension_numbers = #tpu.dot_dimension_numbers<[1], [0], [0], [1], [0, 0, 1, 1], [], []>} : vector<16x32xf32>, vector<32x96xf32>, vector<16x96xf32> -> vector<16x96xf32>
    %c0_3 = arith.constant 0 : index
    %c0_4 = arith.constant 0 : index
    %3 = vector.load %arg5[%c0_3, %c0_4] : memref<32x128xf32, #tpu.memory_space<vmem>>, vector<32x128xf32>
    %cst_5 = arith.constant dense<0.000000e+00> : vector<16x128xf32>
    %4 = tpu.matmul %0, %3, %cst_5 {dimension_numbers = #tpu.dot_dimension_numbers<[1], [0], [0], [1], [0, 0, 1, 1], [], []>} : vector<16x32xf32>, vector<32x128xf32>, vector<16x128xf32> -> vector<16x128xf32>
    %c0_6 = arith.constant 0 : index
    %c0_7 = arith.constant 0 : index
    %5 = vector.load %arg6[%c0_6, %c0_7] : memref<128x96xf32, #tpu.memory_space<vmem>>, vector<128x96xf32>
    %cst_8 = arith.constant dense<0.000000e+00> : vector<16x96xf32>
    %6 = tpu.matmul %4, %5, %cst_8 {dimension_numbers = #tpu.dot_dimension_numbers<[1], [0], [0], [1], [0, 0, 1, 1], [], []>} : vector<16x128xf32>, vector<128x96xf32>, vector<16x96xf32> -> vector<16x96xf32>
    %c0_9 = arith.constant 0 : index
    %c0_10 = arith.constant 0 : index
    %7 = vector.load %arg4[%c0_9, %c0_10] : memref<1x96xf32, #tpu.memory_space<vmem>>, vector<1x96xf32>
    %8 = vector.broadcast %7 : vector<1x96xf32> to vector<16x96xf32>
    %9 = arith.addf %2, %8 : vector<16x96xf32>
    %10 = arith.addf %9, %6 : vector<16x96xf32>
    %c0_11 = arith.constant 0 : index
    %c0_12 = arith.constant 0 : index
    %11 = vector.load %arg7[%c0_11, %c0_12] : memref<16x96xf32, #tpu.memory_space<vmem>>, vector<16x96xf32>
    tpu.vector_store %arg7[%c0_11, %c0_12], %10 {strides = array<i32>} : memref<16x96xf32, #tpu.memory_space<vmem>>, vector<16x96xf32>,
    return
  }
  func.func @transform_0(%arg0: i32, %arg1: i32) -> (i32, i32) {
    %c0_i32 = arith.constant 0 : i32
    %c0_i32_0 = arith.constant 0 : i32
    return %arg1, %c0_i32 : i32, i32
  }
  func.func @transform_1(%arg0: i32, %arg1: i32) -> (i32, i32) {
    %c0_i32 = arith.constant 0 : i32
    %c0_i32_0 = arith.constant 0 : i32
    return %c0_i32, %arg0 : i32, i32
  }
  func.func @transform_2(%arg0: i32, %arg1: i32) -> (i32, i32) {
    %c0_i32 = arith.constant 0 : i32
    %c0_i32_0 = arith.constant 0 : i32
    return %c0_i32, %arg0 : i32, i32
  }
  func.func @transform_3(%arg0: i32, %arg1: i32) -> (i32, i32) {
    %c0_i32 = arith.constant 0 : i32
    %c0_i32_0 = arith.constant 0 : i32
    %c0_i32_1 = arith.constant 0 : i32
    return %c0_i32, %c0_i32_0 : i32, i32
  }
  func.func @transform_4(%arg0: i32, %arg1: i32) -> (i32, i32) {
    %c0_i32 = arith.constant 0 : i32
    %c0_i32_0 = arith.constant 0 : i32
    return %c0_i32, %arg0 : i32, i32
  }
  func.func @transform_5(%arg0: i32, %arg1: i32) -> (i32, i32) {
    %c0_i32 = arith.constant 0 : i32
    return %arg1, %arg0 : i32, i32
  }
}

module attributes {stable_mosaic.version = 11 : i64} {
  func.func @kernel(%arg0: i32, %arg1: i32, %arg2: memref<16x32xf32, #tpu.memory_space<vmem>>, %arg3: memref<32x96xf32, #tpu.memory_space<vmem>>, %arg4: memref<1x96xf32, #tpu.memory_space<vmem>>, %arg5: memref<32x128xf32, #tpu.memory_space<vmem>>, %arg6: memref<128x96xf32, #tpu.memory_space<vmem>>, %arg7: memref<16x96xf32, #tpu.memory_space<vmem>>) attributes {dimension_semantics = [#tpu.dimension_semantics<parallel>, #tpu.dimension_semantics<parallel>], iteration_bounds = array<i64: 1, 1>, scalar_prefetch = 0 : i64, scratch_operands = 0 : i64, tpu.core_type = #tpu.core_type<tc>, window_params = [{transform_indices = @transform_0, window_bounds = array<i64: 16, 32>}, {transform_indices = @transform_1, window_bounds = array<i64: 32, 96>}, {transform_indices = @transform_2, window_bounds = array<i64: 1, 96>}, {pipeline_mode = #tpu.pipeline_mode<synchronous>, transform_indices = @transform_3, window_bounds = array<i64: 32, 128>}, {transform_indices = @transform_4, window_bounds = array<i64: 128, 96>}, {transform_indices = @transform_5, window_bounds = array<i64: 16, 96>}]} {
    %c0 = arith.constant 0 : index
    %c0_0 = arith.constant 0 : index
    %0 = vector.load %arg2[%c0, %c0_0] : memref<16x32xf32, #tpu.memory_space<vmem>>, vector<16x32xf32>
    %c0_1 = arith.constant 0 : index
    %c0_2 = arith.constant 0 : index
    %1 = vector.load %arg3[%c0_1, %c0_2] : memref<32x96xf32, #tpu.memory_space<vmem>>, vector<32x96xf32>
    %cst = arith.constant dense<0.000000e+00> : vector<16x96xf32>
    %2 = tpu.matmul %0, %1, %cst {dimension_numbers = #tpu.dot_dimension_numbers<[1], [0], [0], [1], [0, 0, 1, 1], [], []>} : vector<16x32xf32>, vector<32x96xf32>, vector<16x96xf32> -> vector<16x96xf32>
    %c0_3 = arith.constant 0 : index
    %c0_4 = arith.constant 0 : index
    %3 = vector.load %arg5[%c0_3, %c0_4] : memref<32x128xf32, #tpu.memory_space<vmem>>, vector<32x128xf32>
    %cst_5 = arith.constant dense<0.000000e+00> : vector<16x128xf32>
    %4 = tpu.matmul %0, %3, %cst_5 {dimension_numbers = #tpu.dot_dimension_numbers<[1], [0], [0], [1], [0, 0, 1, 1], [], []>} : vector<16x32xf32>, vector<32x128xf32>, vector<16x128xf32> -> vector<16x128xf32>
    %c0_6 = arith.constant 0 : index
    %c0_7 = arith.constant 0 : index
    %5 = vector.load %arg6[%c0_6, %c0_7] : memref<128x96xf32, #tpu.memory_space<vmem>>, vector<128x96xf32>
    %cst_8 = arith.constant dense<0.000000e+00> : vector<16x96xf32>
    %6 = tpu.matmul %4, %5, %cst_8 {dimension_numbers = #tpu.dot_dimension_numbers<[1], [0], [0], [1], [0, 0, 1, 1], [], []>} : vector<16x128xf32>, vector<128x96xf32>, vector<16x96xf32> -> vector<16x96xf32>
    %c0_9 = arith.constant 0 : index
    %c0_10 = arith.constant 0 : index
    %7 = vector.load %arg4[%c0_9, %c0_10] : memref<1x96xf32, #tpu.memory_space<vmem>>, vector<1x96xf32>
    %8 = vector.broadcast %7 : vector<1x96xf32> to vector<16x96xf32>
    %9 = arith.addf %2, %8 : vector<16x96xf32>
    %10 = arith.addf %9, %6 : vector<16x96xf32>
    %c0_11 = arith.constant 0 : index
    %c0_12 = arith.constant 0 : index
    %11 = vector.load %arg7[%c0_11, %c0_12] : memref<16x96xf32, #tpu.memory_space<vmem>>, vector<16x96xf32>
    tpu.vector_store %arg7[%c0_11, %c0_12], %10 {strides = array<i32>} : memref<16x96xf32, #tpu.memory_space<vmem>>, vector<16x96xf32>,
    return
  }
  func.func @transform_0(%arg0: i32, %arg1: i32) -> (i32, i32) {
    %c0_i32 = arith.constant 0 : i32
    %c0_i32_0 = arith.constant 0 : i32
    return %arg1, %c0_i32 : i32, i32
  }
  func.func @transform_1(%arg0: i32, %arg1: i32) -> (i32, i32) {
    %c0_i32 = arith.constant 0 : i32
    %c0_i32_0 = arith.constant 0 : i32
    return %c0_i32, %arg0 : i32, i32
  }
  func.func @transform_2(%arg0: i32, %arg1: i32) -> (i32, i32) {
    %c0_i32 = arith.constant 0 : i32
    %c0_i32_0 = arith.constant 0 : i32
    return %c0_i32, %arg0 : i32, i32
  }
  func.func @transform_3(%arg0: i32, %arg1: i32) -> (i32, i32) {
    %c0_i32 = arith.constant 0 : i32
    %c0_i32_0 = arith.constant 0 : i32
    %c0_i32_1 = arith.constant 0 : i32
    return %c0_i32, %c0_i32_0 : i32, i32
  }
  func.func @transform_4(%arg0: i32, %arg1: i32) -> (i32, i32) {
    %c0_i32 = arith.constant 0 : i32
    %c0_i32_0 = arith.constant 0 : i32
    return %c0_i32, %arg0 : i32, i32
  }
  func.func @transform_5(%arg0: i32, %arg1: i32) -> (i32, i32) {
    %c0_i32 = arith.constant 0 : i32
    return %arg1, %arg0 : i32, i32
  }
}

</mosaic_0001>

<bundles_post_ra>
// kernel: tpu_custom_call.1
= control target key start
LH: loop header
LB: loop body
LE: loop exit
PB: predicated region body
PF: predicated region fallthrough
CT: control target
= control target key end

     0   :  { %vm31_vm0 = vcmask 261120   ;;  %s545_s0 = inlined_call_operand.vmem [shape: f32[16,32], index: 0, kind: input, shape index: {}]   ;;  %s546_s1 = inlined_call_operand.vmem [shape: f32[32,96], index: 1, kind: input, shape index: {}]   ;;  %s547_s2 = inlined_call_operand.vmem [shape: f32[1,96], index: 2, kind: input, shape index: {}]   ;;  %s548_s3 = inlined_call_operand.vmem [shape: f32[32,128], index: 3, kind: input, shape index: {}]   ;;  %s549_s4 = inlined_call_operand.vmem [shape: f32[128,96], index: 4, kind: input, shape index: {}]   ;;  %s550_s5 = inlined_call_operand.hbm [shape: f32[16,96], index: 5, kind: output, shape index: {}]  }
   0x1   :  { %v30_v0 = vld [vmem:[%s548_s3 + $0x18] sm:$0xff]  ;;  %v29_v1 = vld [vmem:[%s548_s3 + $0x10] sm:$0xff]  ;;  %v21_v2 = vld [vmem:[%s545_s0] sm:$0xff] }
   0x2   :  { %342 = vmatprep.subr.mxu0 %v30_v0  ;;  %v28_v3 = vld [vmem:[%s548_s3 + $0x8] sm:$0xff]  ;;  %350 = vmatprep.mubr.msk.f32.mxu0 %vm31_vm0, %v21_v2  ;;  %v128_v4 = vld [vmem:[%s549_s4 + $0x78] sm:$0xff]  ;;  %v127_v5 = vld [vmem:[%s549_s4 + $0x70] sm:$0xff] }
   0x3   :  { %343 = vmatpush3.msra.mxu0 %v30_v0  ;;  %353 = vmatprep.subr.mxu1 %v128_v4  ;;  %v27_v6 = vld [vmem:[%s548_s3] sm:$0xff]  ;;  %v126_v7 = vld [vmem:[%s549_s4 + $0x68] sm:$0xff]  ;;  %v26_v10 = vld [vmem:[%s546_s1 + $0x18] sm:$0xff] }
   0x4   :  { %344 = vmatprep.subr.mxu0 %v29_v1  ;;  %354 = vmatpush3.msra.mxu1 %v128_v4  ;;  %v22_v8 = vld [vmem:[%s545_s0 + $0x8] sm:$0xff]  ;;  %v125_v9 = vld [vmem:[%s549_s4 + $0x60] sm:$0xff]  ;;  %v124_v11 = vld [vmem:[%s549_s4 + $0x58] sm:$0xff] }
   0x5   :  { %345 = vmatpush3.msra.mxu0 %v29_v1  ;;  %355 = vmatprep.subr.mxu1 %v127_v5 }
   0x6   :  { %346 = vmatprep.subr.mxu0 %v28_v3  ;;  %356 = vmatpush3.msra.mxu1 %v127_v5 }
   0x7   :  { %347 = vmatpush3.msra.mxu0 %v28_v3  ;;  %357 = vmatprep.subr.mxu1 %v126_v7 }
   0x8   :  { %348 = vmatprep.subr.mxu0 %v27_v6  ;;  %358 = vmatpush3.msra.mxu1 %v126_v7 }
   0x9   :  { %349 = vmatpush3.msra.mxu0 %v27_v6 }
   0xa   :  { %10 = vsyncpa [#allocation3], 0  ;;  %351 = vmatmul.mubr.msk.f32.vlgmr.msra.gmra.mxu0 %vm31_vm0, %v22_v8  ;;  %359 = vmatprep.subr.mxu1 %v125_v9  ;;  %v25_v12 = vld [vmem:[%s546_s1 + $0x10] sm:$0xff]  ;;  %v24_v14 = vld [vmem:[%s546_s1 + $0x8] sm:$0xff]  ;;  %s424_s17 = smov [#allocation2]   ;;  %vm288_vm1 = vcmask 785408  }
   0xb   :  { %360 = vmatpush3.msra.mxu1 %v125_v9  ;;  %v123_v13 = vld [vmem:[%s549_s4 + $0x50] sm:$0xff]  ;;  %388 = vmatprep.subr.mxu0 %v26_v10  ;;  %v122_v15 = vld [vmem:[%s549_s4 + $0x48] sm:$0xff]  ;;  %v23_v16 = vld [vmem:[%s546_s1] sm:$0xff]  ;;  %s296_s18 = sshll.u32 %s424_s17, 4  ;;  %s297_s18 = int_to_ptr.vmem [resolvable:$true] %s296_s18 }
   0xc   :  { %361 = vmatprep.subr.mxu1 %v124_v11  ;;  %389 = vmatpush3.msra.mxu0 %v26_v10  ;;  %v121_v17 = vld [vmem:[%s549_s4 + $0x40] sm:$0xff]  ;;  %v120_v18 = vld [vmem:[%s549_s4 + $0x38] sm:$0xff]  ;;  %v119_v19 = vld [vmem:[%s549_s4 + $0x30] sm:$0xff]  ;;  %p407_p1 = scmp.lt.s32.totalorder %s297_s18, %s297_s18 }
   0xd   :  { %362 = vmatpush3.msra.mxu1 %v124_v11  ;;  %390 = vmatprep.subr.mxu0 %v25_v12  ;;  %v118_v20 = vld [vmem:[%s549_s4 + $0x28] sm:$0xff]  ;;  %v117_v21 = vld [vmem:[%s549_s4 + $0x20] sm:$0xff]  ;;  %v116_v22 = vld [vmem:[%s549_s4 + $0x18] sm:$0xff] }
   0xe   :  { %363 = vmatprep.subr.mxu1 %v123_v13  ;;  %391 = vmatpush3.msra.mxu0 %v25_v12  ;;  %v115_v23 = vld [vmem:[%s549_s4 + $0x10] sm:$0xff]  ;;  %v114_v24 = vld [vmem:[%s549_s4 + $0x8] sm:$0xff]  ;;  %v113_v25 = vld [vmem:[%s549_s4] sm:$0xff]  ;;  %s402_s4 = scalar_lea.vmem %s297_s18, 256 }
   0xf   :  { %364 = vmatpush3.msra.mxu1 %v123_v13  ;;  %392 = vmatprep.subr.mxu0 %v24_v14  ;;  %v309_v29 = vld [vmem:[%s547_s2] ss:$0 sm:$0xff]  ;;  %p403_p0 = scmp.ne.s32.totalorder %s297_s18, %s402_s4  ;;  %p408_p2 = scmp.lt.s32.totalorder %s402_s4, %s402_s4 }
  0x10   :  { %365 = vmatprep.subr.mxu1 %v122_v15  ;;  %393 = vmatpush3.msra.mxu0 %v24_v14 }
  0x11   :  { %366 = vmatpush3.msra.mxu1 %v122_v15  ;;  %394 = vmatprep.subr.mxu0 %v23_v16  ;;  %p409_p3 = por %p408_p2, %p407_p1 }
  0x12   :  { %367 = vmatprep.subr.mxu1 %v121_v17  ;;  %395 = vmatpush3.msra.mxu0 %v23_v16 }
  0x13   :  { %368 = vmatpush3.msra.mxu1 %v121_v17  ;;  %396 = vmatprep.mubr.msk.f32.mxu0 %vm31_vm0, %v21_v2  ;;  %p410_p4 = pnand %p409_p3, %p403_p0 }
  0x14   :  { %369 = vmatprep.subr.mxu1 %v120_v18  ;;  %397 = vmatmul.mubr.msk.f32.vlgmr.msra.gmra.mxu0 %vm31_vm0, %v22_v8 }
  0x15   :  { %370 = vmatpush3.msra.mxu1 %v120_v18 }
  0x16   :  { %371 = vmatprep.subr.mxu1 %v119_v19 }
  0x17   :  { %372 = vmatpush3.msra.mxu1 %v119_v19 }
  0x18   :  { %373 = vmatprep.subr.mxu1 %v118_v20 }
  0x19   :  { %374 = vmatpush3.msra.mxu1 %v118_v20 }
  0x1a   :  { %375 = vmatprep.subr.mxu1 %v117_v21 }
  0x1b   :  { %376 = vmatpush3.msra.mxu1 %v117_v21 }
  0x1c   :  { %377 = vmatprep.subr.mxu1 %v116_v22 }
  0x1d   :  { %378 = vmatpush3.msra.mxu1 %v116_v22 }
  0x1e   :  { %379 = vmatprep.subr.mxu1 %v115_v23 }
  0x1f   :  { %380 = vmatpush3.msra.mxu1 %v115_v23 }
  0x20   :  { %381 = vmatprep.subr.mxu1 %v114_v24 }
  0x21   :  { %382 = vmatpush3.msra.mxu1 %v114_v24 }
  0x22   :  { %383 = vmatprep.subr.mxu1 %v113_v25 }
  0x23   :  { %384 = vmatpush3.msra.mxu1 %v113_v25 }
  0xca   :  { %v352_v26 = vpop.f32.mrf.mxu0 }
  0xcc   :  { %v104_v27 = vpop.f32.mrf.mxu0 }
  0xcd   :  { %385 = vmatprep.mubr.f32.mxu1 %v104_v27 }
  0xce   :  { %386 = vmatmul.mubr.f32.vlgmr.msra.gmra.mxu1 %v352_v26 }
  0xd4   :  { %v398_v28 = vpop.f32.mrf.mxu0 }
  0xd5   :  { %v283_v30 = vadd.f32 %v398_v28, %v309_v29 }
  0xd6   :  { %v277_v31 = vpop.f32.mrf.mxu0 }
  0xd7   :  { %v278_v33 = vadd.f32 %v309_v29, %v277_v31 }
 0x18e   :  { %v387_v32 = vpop.f32.mrf.mxu1 }
 0x18f   :  { %v287_v34 = vadd.f32 %v387_v32, %v283_v30 }
 0x190   :  { %v195_v35 = vpop.f32.mrf.mxu1 }
 0x191   :  { %290 = vst.msk [vmem:[#allocation2 + $0x8] sm:$0xff] %vm288_vm1, %v287_v34  ;;  %v286_v36 = vadd.f32 %v278_v33, %v195_v35 }
 0x193   :  { %289 = vst.msk [vmem:[#allocation2] sm:$0xff] %vm288_vm1, %v286_v36 }
 0x194   :  { %413 = shalt.err (!%p410_p4)
}
 0x195   :  { %s425_s2 = smov 128   ;;  %s426_s19 = smov 8  }
 0x196   :  { %302 = dma.vmem_to_hbm [thread:$0]  %s297_s18, 256, %s550_s5, [#allocation3], %s425_s2, %s425_s2, %s426_s19  }
 0x197   :  { %422 = dma.done.wait [#allocation3], 256  }
 0x198   :  { %423 = vsyncadd [#allocation3], 4294967040 }
 0x199   :  { %306 = vsyncpa [#allocation3], 1 }

// kernel: tpu_custom_call.1
= control target key start
LH: loop header
LB: loop body
LE: loop exit
PB: predicated region body
PF: predicated region fallthrough
CT: control target
= control target key end

     0   :  { %vm31_vm0 = vcmask 261120   ;;  %s545_s0 = inlined_call_operand.vmem [shape: f32[16,32], index: 0, kind: input, shape index: {}]   ;;  %s546_s1 = inlined_call_operand.vmem [shape: f32[32,96], index: 1, kind: input, shape index: {}]   ;;  %s547_s2 = inlined_call_operand.vmem [shape: f32[1,96], index: 2, kind: input, shape index: {}]   ;;  %s548_s3 = inlined_call_operand.vmem [shape: f32[32,128], index: 3, kind: input, shape index: {}]   ;;  %s549_s4 = inlined_call_operand.vmem [shape: f32[128,96], index: 4, kind: input, shape index: {}]   ;;  %s550_s5 = inlined_call_operand.hbm [shape: f32[16,96], index: 5, kind: output, shape index: {}]  }
   0x1   :  { %v30_v0 = vld [vmem:[%s548_s3 + $0x18] sm:$0xff]  ;;  %v29_v1 = vld [vmem:[%s548_s3 + $0x10] sm:$0xff]  ;;  %v21_v2 = vld [vmem:[%s545_s0] sm:$0xff] }
   0x2   :  { %342 = vmatprep.subr.mxu0 %v30_v0  ;;  %v28_v3 = vld [vmem:[%s548_s3 + $0x8] sm:$0xff]  ;;  %350 = vmatprep.mubr.msk.f32.mxu0 %vm31_vm0, %v21_v2  ;;  %v128_v4 = vld [vmem:[%s549_s4 + $0x78] sm:$0xff]  ;;  %v127_v5 = vld [vmem:[%s549_s4 + $0x70] sm:$0xff] }
   0x3   :  { %343 = vmatpush3.msra.mxu0 %v30_v0  ;;  %353 = vmatprep.subr.mxu1 %v128_v4  ;;  %v27_v6 = vld [vmem:[%s548_s3] sm:$0xff]  ;;  %v126_v7 = vld [vmem:[%s549_s4 + $0x68] sm:$0xff]  ;;  %v26_v10 = vld [vmem:[%s546_s1 + $0x18] sm:$0xff] }
   0x4   :  { %344 = vmatprep.subr.mxu0 %v29_v1  ;;  %354 = vmatpush3.msra.mxu1 %v128_v4  ;;  %v22_v8 = vld [vmem:[%s545_s0 + $0x8] sm:$0xff]  ;;  %v125_v9 = vld [vmem:[%s549_s4 + $0x60] sm:$0xff]  ;;  %v124_v11 = vld [vmem:[%s549_s4 + $0x58] sm:$0xff] }
   0x5   :  { %345 = vmatpush3.msra.mxu0 %v29_v1  ;;  %355 = vmatprep.subr.mxu1 %v127_v5 }
   0x6   :  { %346 = vmatprep.subr.mxu0 %v28_v3  ;;  %356 = vmatpush3.msra.mxu1 %v127_v5 }
   0x7   :  { %347 = vmatpush3.msra.mxu0 %v28_v3  ;;  %357 = vmatprep.subr.mxu1 %v126_v7 }
   0x8   :  { %348 = vmatprep.subr.mxu0 %v27_v6  ;;  %358 = vmatpush3.msra.mxu1 %v126_v7 }
   0x9   :  { %349 = vmatpush3.msra.mxu0 %v27_v6 }
   0xa   :  { %10 = vsyncpa [#allocation3], 0  ;;  %351 = vmatmul.mubr.msk.f32.vlgmr.msra.gmra.mxu0 %vm31_vm0, %v22_v8  ;;  %359 = vmatprep.subr.mxu1 %v125_v9  ;;  %v25_v12 = vld [vmem:[%s546_s1 + $0x10] sm:$0xff]  ;;  %v24_v14 = vld [vmem:[%s546_s1 + $0x8] sm:$0xff]  ;;  %s424_s17 = smov [#allocation2]   ;;  %vm288_vm1 = vcmask 785408  }
   0xb   :  { %360 = vmatpush3.msra.mxu1 %v125_v9  ;;  %v123_v13 = vld [vmem:[%s549_s4 + $0x50] sm:$0xff]  ;;  %388 = vmatprep.subr.mxu0 %v26_v10  ;;  %v122_v15 = vld [vmem:[%s549_s4 + $0x48] sm:$0xff]  ;;  %v23_v16 = vld [vmem:[%s546_s1] sm:$0xff]  ;;  %s296_s18 = sshll.u32 %s424_s17, 4  ;;  %s297_s18 = int_to_ptr.vmem [resolvable:$true] %s296_s18 }
   0xc   :  { %361 = vmatprep.subr.mxu1 %v124_v11  ;;  %389 = vmatpush3.msra.mxu0 %v26_v10  ;;  %v121_v17 = vld [vmem:[%s549_s4 + $0x40] sm:$0xff]  ;;  %v120_v18 = vld [vmem:[%s549_s4 + $0x38] sm:$0xff]  ;;  %v119_v19 = vld [vmem:[%s549_s4 + $0x30] sm:$0xff]  ;;  %p407_p1 = scmp.lt.s32.totalorder %s297_s18, %s297_s18 }
   0xd   :  { %362 = vmatpush3.msra.mxu1 %v124_v11  ;;  %390 = vmatprep.subr.mxu0 %v25_v12  ;;  %v118_v20 = vld [vmem:[%s549_s4 + $0x28] sm:$0xff]  ;;  %v117_v21 = vld [vmem:[%s549_s4 + $0x20] sm:$0xff]  ;;  %v116_v22 = vld [vmem:[%s549_s4 + $0x18] sm:$0xff] }
   0xe   :  { %363 = vmatprep.subr.mxu1 %v123_v13  ;;  %391 = vmatpush3.msra.mxu0 %v25_v12  ;;  %v115_v23 = vld [vmem:[%s549_s4 + $0x10] sm:$0xff]  ;;  %v114_v24 = vld [vmem:[%s549_s4 + $0x8] sm:$0xff]  ;;  %v113_v25 = vld [vmem:[%s549_s4] sm:$0xff]  ;;  %s402_s4 = scalar_lea.vmem %s297_s18, 256 }
   0xf   :  { %364 = vmatpush3.msra.mxu1 %v123_v13  ;;  %392 = vmatprep.subr.mxu0 %v24_v14  ;;  %v309_v29 = vld [vmem:[%s547_s2] ss:$0 sm:$0xff]  ;;  %p403_p0 = scmp.ne.s32.totalorder %s297_s18, %s402_s4  ;;  %p408_p2 = scmp.lt.s32.totalorder %s402_s4, %s402_s4 }
  0x10   :  { %365 = vmatprep.subr.mxu1 %v122_v15  ;;  %393 = vmatpush3.msra.mxu0 %v24_v14 }
  0x11   :  { %366 = vmatpush3.msra.mxu1 %v122_v15  ;;  %394 = vmatprep.subr.mxu0 %v23_v16  ;;  %p409_p3 = por %p408_p2, %p407_p1 }
  0x12   :  { %367 = vmatprep.subr.mxu1 %v121_v17  ;;  %395 = vmatpush3.msra.mxu0 %v23_v16 }
  0x13   :  { %368 = vmatpush3.msra.mxu1 %v121_v17  ;;  %396 = vmatprep.mubr.msk.f32.mxu0 %vm31_vm0, %v21_v2  ;;  %p410_p4 = pnand %p409_p3, %p403_p0 }
  0x14   :  { %369 = vmatprep.subr.mxu1 %v120_v18  ;;  %397 = vmatmul.mubr.msk.f32.vlgmr.msra.gmra.mxu0 %vm31_vm0, %v22_v8 }
  0x15   :  { %370 = vmatpush3.msra.mxu1 %v120_v18 }
  0x16   :  { %371 = vmatprep.subr.mxu1 %v119_v19 }
  0x17   :  { %372 = vmatpush3.msra.mxu1 %v119_v19 }
  0x18   :  { %373 = vmatprep.subr.mxu1 %v118_v20 }
  0x19   :  { %374 = vmatpush3.msra.mxu1 %v118_v20 }
  0x1a   :  { %375 = vmatprep.subr.mxu1 %v117_v21 }
  0x1b   :  { %376 = vmatpush3.msra.mxu1 %v117_v21 }
  0x1c   :  { %377 = vmatprep.subr.mxu1 %v116_v22 }
  0x1d   :  { %378 = vmatpush3.msra.mxu1 %v116_v22 }
  0x1e   :  { %379 = vmatprep.subr.mxu1 %v115_v23 }
  0x1f   :  { %380 = vmatpush3.msra.mxu1 %v115_v23 }
  0x20   :  { %381 = vmatprep.subr.mxu1 %v114_v24 }
  0x21   :  { %382 = vmatpush3.msra.mxu1 %v114_v24 }
  0x22   :  { %383 = vmatprep.subr.mxu1 %v113_v25 }
  0x23   :  { %384 = vmatpush3.msra.mxu1 %v113_v25 }
  0xca   :  { %v352_v26 = vpop.f32.mrf.mxu0 }
  0xcc   :  { %v104_v27 = vpop.f32.mrf.mxu0 }
  0xcd   :  { %385 = vmatprep.mubr.f32.mxu1 %v104_v27 }
  0xce   :  { %386 = vmatmul.mubr.f32.vlgmr.msra.gmra.mxu1 %v352_v26 }
  0xd4   :  { %v398_v28 = vpop.f32.mrf.mxu0 }
  0xd5   :  { %v283_v30 = vadd.f32 %v398_v28, %v309_v29 }
  0xd6   :  { %v277_v31 = vpop.f32.mrf.mxu0 }
  0xd7   :  { %v278_v33 = vadd.f32 %v309_v29, %v277_v31 }
 0x18e   :  { %v387_v32 = vpop.f32.mrf.mxu1 }
 0x18f   :  { %v287_v34 = vadd.f32 %v387_v32, %v283_v30 }
 0x190   :  { %v195_v35 = vpop.f32.mrf.mxu1 }
 0x191   :  { %290 = vst.msk [vmem:[#allocation2 + $0x8] sm:$0xff] %vm288_vm1, %v287_v34  ;;  %v286_v36 = vadd.f32 %v278_v33, %v195_v35 }
 0x193   :  { %289 = vst.msk [vmem:[#allocation2] sm:$0xff] %vm288_vm1, %v286_v36 }
 0x194   :  { %413 = shalt.err (!%p410_p4)
}
 0x195   :  { %s425_s2 = smov 128   ;;  %s426_s19 = smov 8  }
 0x196   :  { %302 = dma.vmem_to_hbm [thread:$0]  %s297_s18, 256, %s550_s5, [#allocation3], %s425_s2, %s425_s2, %s426_s19  }
 0x197   :  { %422 = dma.done.wait [#allocation3], 256  }
 0x198   :  { %423 = vsyncadd [#allocation3], 4294967040 }
 0x199   :  { %306 = vsyncpa [#allocation3], 1 }

</bundles_post_ra>
